<compile_context>
chip_gen: v7x
topology: tpu7x:2x2x1
jax: 0.10.0
libtpu: 0.0.40
codegen_flags: <defaults>
</compile_context>

<pallas_src>
import jax
import jax.numpy as jnp
import numpy as np
from jax.experimental import pallas as pl
from jax.experimental.pallas import tpu as pltpu


def _upsample_kernel(x_ref, sel_ref, o_ref):
    # x_ref:   (Rblk, G*W)          input rows (native dtype, fed straight to MXU)
    # sel_ref: (G*W, G*s*s*W)       tiled one-hot selection matrix (x.dtype)
    # o_ref:   (Rblk, G*s*s*W)      fused (row-group, replica, Ws) output view
    z = jnp.dot(x_ref[...], sel_ref[...], preferred_element_type=jnp.float32)
    o_ref[...] = z.astype(o_ref.dtype)  # exact: one-hot matmul copies input values


def _round_up(n, m):
    return ((n + m - 1) // m) * m


def _pick_group(rows, s2w):
    """Smallest divisor G of `rows` so the folded output lane width G*s2w is
    >= 128 (unmasked, lane-dense stores), bounded so sel stays tiny."""
    if s2w >= 128:
        return 1
    best = 1
    limit = max(1, 1024 // s2w)  # never fold more than ~1024 output lanes
    for g in range(1, min(rows, limit) + 1):
        if rows % g == 0:
            best = g
            if g * s2w >= 128:
                return g
    # TODO(synk): row counts with no small divisor reaching 128 lanes keep
    # sub-128-lane output blocks (masked stores): correct, just slower.
    return best


def _pick_row_block(rows_g, in_lanes, out_lanes, itemsize):
    """Row-block size targeting ~4 MiB of HBM in+out per step, >= 8 grid steps,
    and full VMEM accounting (double-buffered I/O tiles + f32 intermediate +
    cast copy + double-buffered sel), with lane padding to 128."""
    align = 8 if itemsize >= 4 else (16 if itemsize == 2 else 32)
    if rows_g <= align:
        return rows_g  # full-extent block (allowed even if not a multiple of 8)

    in_b = _round_up(in_lanes, 128) * itemsize
    out_b = _round_up(out_lanes, 128) * itemsize
    f32_b = _round_up(out_lanes, 128) * 4
    # double-buffered in + out tiles, plus f32 matmul result + casted copy
    per_row_vmem = 2 * (in_b + out_b) + 2 * f32_b
    per_row_hbm = (in_lanes + out_lanes) * itemsize

    # sel is a grid input with a constant index_map: no re-DMA after step 0,
    # but Pallas still allocates two buffers — count them.
    sel_vmem = 2 * _round_up(in_lanes, 8) * _round_up(out_lanes, 128) * itemsize
    budget = max(4 * 1024 * 1024, 24 * 1024 * 1024 - sel_vmem)

    target = max(1, (4 * 1024 * 1024) // max(1, per_row_hbm))
    vmem_cap = max(1, budget // max(1, per_row_vmem))
    cap = min(target, vmem_cap)
    if rows_g >= 8 * align:
        cap = min(cap, rows_g // 8)  # >= 8 pipelined steps (overlap + megacore)

    rblk = max(align, min(rows_g, cap))
    rblk -= rblk % align
    rblk = max(align, rblk)

    # Prefer an exact divisor near the target (no ragged tail), but never shrink
    # below half the target just to find one.
    lo = max(align, (rblk // 2) - ((rblk // 2) % align))
    for cand in range(rblk, lo - 1, -align):
        if rows_g % cand == 0:
            return cand
    return rblk  # ragged tail block handled by the cdiv grid


def resolution_scaling_layer(x, scale_factor=2):
    """Nearest-neighbor upsample of an NCHW tensor by an integer scale factor."""
    if scale_factor != int(scale_factor):
        # TODO(synk): fractional nearest-neighbor scales (allowed by F.interpolate)
        # are not supported by this kernel.
        raise ValueError(f"scale_factor must be an integer, got {scale_factor!r}")
    s = int(scale_factor)
    if s == 1:
        return x
    N, C, H, W = x.shape
    Hs, Ws = H * s, W * s

    if not jnp.issubdtype(x.dtype, jnp.floating):
        # TODO(synk): integer dtypes skip the MXU path (v7x MXU has no int mode;
        # f32 path is only exact for |v| < 2**24) and use plain XLA repeat.
        return jnp.repeat(jnp.repeat(x, s, axis=2), s, axis=3)

    rows = N * C * H          # fused batch/channel/row axis
    s2w = s * s * W           # output lanes produced per fused input row
    G = _pick_group(rows, s2w)
    rows_g = rows // G
    in_lanes = G * W
    out_lanes = G * s2w

    itemsize = jnp.dtype(x.dtype).itemsize
    rblk = _pick_row_block(rows_g, in_lanes, out_lanes, itemsize)
    grid = (pl.cdiv(rows_g, rblk),)

    # Tiled one-hot selection matrix (G*W, G*s*s*W), built in x.dtype so the MXU
    # is fed natively.  sel[j, c] = 1 iff j == (c // s2w) * W + (c % Ws) // s:
    # output lane c = g*s*Ws + r*Ws + b  ->  value x3[row, g*W + b // s].
    j = jnp.arange(in_lanes)[:, None]
    c = jnp.arange(out_lanes)[None, :]
    sel = (j == (c // s2w) * W + (c % Ws) // s).astype(x.dtype)

    # Contiguous NCHW -> grouped 2-D row view (free reshape).
    x3 = x.reshape(rows_g, in_lanes)

    bytes_accessed = (rows_g * in_lanes + rows_g * out_lanes
                      + in_lanes * out_lanes) * itemsize
    flops = 2 * rows_g * in_lanes * out_lanes

    out3 = pl.pallas_call(
        _upsample_kernel,
        out_shape=jax.ShapeDtypeStruct((rows_g, out_lanes), x.dtype),
        grid=grid,
        in_specs=[
            pl.BlockSpec((rblk, in_lanes), lambda i: (i, 0)),
            pl.BlockSpec((in_lanes, out_lanes), lambda i: (0, 0)),
        ],
        out_specs=pl.BlockSpec((rblk, out_lanes), lambda i: (i, 0)),
        compiler_params=pltpu.CompilerParams(
            dimension_semantics=("parallel",),
            vmem_limit_bytes=32 * 1024 * 1024,
        ),
        cost_estimate=pl.CostEstimate(
            flops=flops, transcendentals=0, bytes_accessed=bytes_accessed),
    )(x3, sel)

    # (rows_g, G*s*Ws) row-major is bit-identical to the (N, C, Hs, Ws) layout:
    # row R, lane g*s*Ws + r*Ws + b  <->  element (n, c, i*s + r, b) with
    # fused row R*G + g = (n*C + c)*H + i.  Free reshape.
    return out3.reshape(N, C, Hs, Ws)


if __name__ == "__main__":
    key = jax.random.PRNGKey(0)
    N, C, H, W = 2, 4, 16, 16
    scale = 2

    x = jax.random.normal(key, (N, C, H, W), dtype=jnp.float32)

    y = jax.block_until_ready(resolution_scaling_layer(x, scale_factor=scale))

    # Reference: nearest-neighbor upsample == repeat along H and W.
    ref = np.repeat(np.repeat(np.asarray(x), scale, axis=2), scale, axis=3)
    assert y.shape == (N, C, H * scale, W * scale), y.shape
    np.testing.assert_allclose(np.asarray(y), ref, rtol=0, atol=0)

    print("KERNEL_OK")
</pallas_src>

<mosaic_0001>
module attributes {stable_mosaic.version = 11 : i64} {
  func.func @_upsample_kernel(%arg0: i32, %arg1: memref<8x32xf32, #tpu.memory_space<vmem>>, %arg2: memref<32x128xf32, #tpu.memory_space<vmem>>, %arg3: memref<8x128xf32, #tpu.memory_space<vmem>>) attributes {dimension_semantics = [#tpu.dimension_semantics<parallel>], iteration_bounds = array<i64: 8>, scalar_prefetch = 0 : i64, scratch_operands = 0 : i64, tpu.core_type = #tpu.core_type<tc>, window_params = [{transform_indices = @transform_0, window_bounds = array<i64: 8, 32>}, {pipeline_mode = #tpu.pipeline_mode<synchronous>, transform_indices = @transform_1, window_bounds = array<i64: 32, 128>}, {transform_indices = @transform_2, window_bounds = array<i64: 8, 128>}]} {
    %c0 = arith.constant 0 : index
    %c0_0 = arith.constant 0 : index
    %0 = vector.load %arg1[%c0, %c0_0] : memref<8x32xf32, #tpu.memory_space<vmem>>, vector<8x32xf32>
    %c0_1 = arith.constant 0 : index
    %c0_2 = arith.constant 0 : index
    %1 = vector.load %arg2[%c0_1, %c0_2] : memref<32x128xf32, #tpu.memory_space<vmem>>, vector<32x128xf32>
    %cst = arith.constant dense<0.000000e+00> : vector<8x128xf32>
    %2 = tpu.matmul %0, %1, %cst {dimension_numbers = #tpu.dot_dimension_numbers<[1], [0], [0], [1], [0, 0, 1, 1], [], []>} : vector<8x32xf32>, vector<32x128xf32>, vector<8x128xf32> -> vector<8x128xf32>
    %c0_3 = arith.constant 0 : index
    %c0_4 = arith.constant 0 : index
    %3 = vector.load %arg3[%c0_3, %c0_4] : memref<8x128xf32, #tpu.memory_space<vmem>>, vector<8x128xf32>
    tpu.vector_store %arg3[%c0_3, %c0_4], %2 {strides = array<i32>} : memref<8x128xf32, #tpu.memory_space<vmem>>, vector<8x128xf32>,
    return
  }
  func.func @transform_0(%arg0: i32) -> (i32, i32) {
    %c0_i32 = arith.constant 0 : i32
    %c0_i32_0 = arith.constant 0 : i32
    return %arg0, %c0_i32 : i32, i32
  }
  func.func @transform_1(%arg0: i32) -> (i32, i32) {
    %c0_i32 = arith.constant 0 : i32
    %c0_i32_0 = arith.constant 0 : i32
    %c0_i32_1 = arith.constant 0 : i32
    return %c0_i32, %c0_i32_0 : i32, i32
  }
  func.func @transform_2(%arg0: i32) -> (i32, i32) {
    %c0_i32 = arith.constant 0 : i32
    %c0_i32_0 = arith.constant 0 : i32
    return %arg0, %c0_i32 : i32, i32
  }
}

</mosaic_0001>

<bundles_post_ra>
// kernel: tpu_custom_call.1
= control target key start
LH: loop header
LB: loop body
LE: loop exit
PB: predicated region body
PF: predicated region fallthrough
CT: control target
= control target key end

     0   :  { %7 = vsyncpa [#allocation3], 0  ;;  %s562_s0 = inlined_call_operand.vmem [shape: f32[64,32], index: 0, kind: input, shape index: {}]   ;;  %s563_s1 = inlined_call_operand.vmem [shape: f32[32,128], index: 1, kind: input, shape index: {}]   ;;  %s564_s2 = inlined_call_operand.hbm [shape: f32[64,128], index: 2, kind: output, shape index: {}]  }
   0x1   :  { %9 = vsyncpa [#allocation3 + $0x1], 0  ;;  %s450_s9 = smov 0   ;;  %s452_s10 = smov 0  }
   0x2   :  { %s454_s11 = smov 0   ;;  %s456_s12 = smov 0  }
   0x3 LB: > { %s471_s13 = sadd.s32 4294967295, %s429_s12   ;;  %s292_s14 = sadd.s32 4294967294, %s429_s12   ;;  %s429_s12 = sphi %s456_s12, %s570_s12   ;;  %s425_s11 = sphi %s454_s11, %s569_s11   ;;  %s421_s10 = sphi %s452_s10, %s568_s10   ;;  %s417_s9 = sphi %s450_s9, %s567_s9  }
   0x4   : > { %s475_s15 = sadd.s32 1, %s429_s12   ;;  %s69_s16 = sadd.s32 1, %s425_s11 }
   0x5   : > { %s66_s17 = ssub.s32 %s429_s12, %s475_s15  ;;  %p79_p0 = scmp.ne.s32.totalorder %s425_s11, %s421_s10 }
   0x6   : > { %p67_p1 = scmp.eq.s32.totalorder %s66_s17, 0  ;;  %p80_p2 = scmp.eq.s32.totalorder %s471_s13, 7 }
   0x7   : > { %p85_p3 = scmp.ne.s32.totalorder %s421_s10, %s417_s9  ;;  %p86_p4 = scmp.eq.s32.totalorder %s292_s14, 7 }
   0x8   : > { %s486_s18 = scalar_select %p67_p1, %s425_s11, %s69_s16  }
   0x9   : > { %p488_p5 = por %p80_p2, %p79_p0  ;;  %p492_p6 = por %p86_p4, %p85_p3 }
   0xa   : > { %p295_p7 = scmp.ge.s32.totalorder %s429_s12, 1  ;;  %p114_p8 = scmp.lt.s32.totalorder %s429_s12, 9 }
   0xc   : > { %p115_p9 = pnand %p295_p7, %p114_p8 }
   0xd   : > { %v140_v0 = vld [vmem:[%s563_s1] sm:$0xff] (!%p115_p9)  ;;  %v141_v1 = vld [vmem:[%s563_s1 + $0x8] sm:$0xff] (!%p115_p9)  ;;  %v142_v2 = vld [vmem:[%s563_s1 + $0x10] sm:$0xff] (!%p115_p9)  ;;  %v431_v3 = vmov (!%p115_p9), 0.0|0.0   ;;  %vm432_vm0 = vmmov (!%p115_p9), 0   ;;  %v433_v6 = vmov (!%p115_p9), 0.0  }
   0xe   : > { %118 = sbr.rel (%p115_p9) target bundleno = 252 (0xfc), region = 28  ;;  %319 = vmatprep.subr.bf16.mxu0 (!%p115_p9), %v431_v3  ;;  %v320_v4 = vpack.c.bf16 (!%p115_p9), %v141_v1, %v140_v0  ;;  %v143_v5 = vld [vmem:[%s563_s1 + $0x18] sm:$0xff] (!%p115_p9)  ;;  %316 = vmatprep.mubr.msk.f32.mxu0 (!%p115_p9), %vm432_vm0, %v433_v6  ;;  %p135_p10 = scmp.lt.s32.totalorder (!%p115_p9), %s471_s13, 7  ;;  %vm144_vm1 = vcmask (!%p115_p9), 261120  }
   0xf   : > { %v323_v7 = vpack.c.bf16 (!%p115_p9), %v143_v5, %v142_v2  ;;  %s132_s6 = sand.u32 (!%p115_p9), 1, %s421_s10   ;;  %s300_s16 = sshll.u32 (!%p115_p9), %s471_s13, 7 }
  0x10   : > { %321 = vmatpush3.bf16.msra.mxu0 (!%p115_p9), %v320_v4  ;;  %s296_s7 = sshll.u32 (!%p115_p9), %s132_s6, 3  ;;  %s522_s22 = scalar_lea.hbm (!%p115_p9), %s564_s2, %s300_s16 }
  0x11   : > { %322 = vmatprep.subr.bf16.mxu0 (!%p115_p9), %v431_v3  ;;  %s134_s8 = scalar_lea.vmem (!%p115_p9), [#allocation2], %s296_s7  ;;  %s220_s23 = scalar_lea.sflag (!%p115_p9), [#allocation3], %s132_s6 }
  0x12   : > { %s233_s14 = sshll.u32 (!%p115_p9), %s134_s8, 4  ;;  %s517_s14 = int_to_ptr.vmem [resolvable:$true] %s233_s14 }
  0x13   : > { %s367_s24 = scalar_lea.vmem (!%p115_p9), %s517_s14, 128 }
  0x14   : > { %324 = vmatpush3.bf16.msra.mxu0 (!%p115_p9), %v323_v7  ;;  %p368_p11 = scmp.ne.s32.totalorder (!%p115_p9), %s517_s14, %s367_s24 }
  0x15   : > { %s136_s29 = scalar_select %p135_p10, %s471_s13, 7 }
  0x16   : > { %p369_p12 = pnand %p368_p11, %p488_p5  ;;  %s434_s13 = smov [#allocation2]  }
  0x17   : > { %s297_s30 = sshll.u32 %s136_s29, 3  ;;  %s371_s25 = sshll.u32 %s434_s13, 4  ;;  %s372_s25 = int_to_ptr.vmem [resolvable:$false] %s371_s25 }
  0x18   : > { %s138_s5 = scalar_lea.vmem %s562_s0, %s297_s30  ;;  %p370_p13 = pneg %p369_p12 }
  0x19   : > { %v139_v8 = vld [vmem:[%s138_s5] sm:$0xff]  ;;  %s373_s26 = scalar_lea.vmem %s372_s25, 256  ;;  %p374_p0 = scmp.lt.s32.totalorder %s517_s14, %s372_s25 }
  0x1a   : > { %317 = vmatmul.mubr.msk.f32.vlgmr.msra.gmra.mrb[0].mxu0 %vm144_vm1, %v139_v8  ;;  %p375_p1 = scmp.lt.s32.totalorder %s373_s26, %s367_s24 }
  0x1c   : > { %p376_p2 = por %p375_p1, %p374_p0 }
  0x1e   : > { %p377_p3 = pnand %p376_p2, %p370_p13 }
  0xed   : > { %v214_v9 = vpop.f32.mrb[0].mxu0 }
  0xee   : > { %218 = vst [vmem:[%s134_s8] sm:$0xff] %v214_v9  ;;  %v318_v10 = vpop.f32.mrb[1].mxu0 }
  0xef   : > { %380 = shalt.err (!%p377_p3)
}
  0xf0   : > { %s381_s27 = scalar_lea.hbm %s522_s22, 128  ;;  %s385_s30 = scalar_lea.hbm %s564_s2, 1024 }
  0xf1   : > { %p382_p4 = scmp.ne.s32.totalorder %s522_s22, %s381_s27  ;;  %p386_p9 = scmp.lt.u32.totalorder %s522_s22, %s564_s2 }
  0xf2   : > { %p387_p10 = scmp.lt.u32.totalorder %s385_s30, %s381_s27  ;;  %p389_p12 = scmp.lt.u32.totalorder %s381_s27, %s522_s22 }
  0xf3   : > { %p383_p7 = pnand %p382_p4, %p488_p5 }
  0xf4   : > { %p388_p11 = por %p387_p10, %p386_p9 }
  0xf5   : > { %p384_p8 = pneg %p383_p7 }
  0xf6   : > { %p390_p13 = por %p389_p12, %p388_p11 }
  0xf8   : > { %p391_p0 = pnand %p390_p13, %p384_p8 }
  0xfa   : > { %394 = shalt.err (!%p391_p0)
}
  0xfb   : > { %325 = dma.vmem_to_hbm [thread:$0]  (%p488_p5), %s517_s14, 128, %s522_s22, %s220_s23  }
  0xfc PF: > { %p331_p1 = scmp.ge.s32.totalorder %s429_s12, 2  ;;  %s245_s5 = sand.u32 1, %s417_s9  }
  0xfd   : > { %s246_s6 = scalar_lea.sflag [#allocation3], %s245_s5 }
  0xfe   : > { %p328_p2 = pnand %p331_p1, %p492_p6 }
 0x100   : > { %412 = dma.done.wait (!%p328_p2), %s246_s6, 128  }
 0x101   : > { %414 = vsyncadd (!%p328_p2), %s246_s6, 4294967168  ;;  %p12_p3 = scmp.ge.s32.totalorder %s475_s15, 10   ;;  %s567_s9 = smov %s421_s10 }
 0x102   : > { %s568_s10 = smov %s425_s11  ;;  %s569_s11 = smov %s486_s18 }
 0x103   : > { %s570_s12 = smov %s475_s15  ;;  %14 = sbr.rel (!%p12_p3) target bundleno = 3 (0x3), region = 63 }
 0x10a   :  { %251 = vsyncpa [#allocation3], 1 }
 0x10b   :  { %253 = vsyncpa [#allocation3 + $0x1], 1 }

</bundles_post_ra>
